<compile_context>
chip_gen: v7x
topology: tpu7x:2x2x1
jax: 0.10.0
libtpu: 0.0.40
codegen_flags: <defaults>
</compile_context>

<pallas_src>
import jax
import jax.numpy as jnp
from jax.experimental import pallas as pl
from jax.experimental.pallas import tpu as pltpu


def gate_mlp_kernel(x_ref, wg_ref, wu_ref, wd_ref, bg_ref, bu_ref, bd_ref,
                    o_ref, acc_ref):
    # x_ref: (TM, H); wg_ref/wu_ref: (H, TI); wd_ref: (TI, H)
    # bg_ref/bu_ref: (1, TI); bd_ref: (1, H); o_ref: (TM, H); acc_ref: (TM, H) f32
    j = pl.program_id(1)

    @pl.when(j == 0)
    def _():
        acc_ref[...] = jnp.zeros_like(acc_ref)

    x = x_ref[...]                                                    # (TM, H)
    g = jnp.dot(x, wg_ref[...], preferred_element_type=jnp.float32) + bg_ref[...]
    u = jnp.dot(x, wu_ref[...], preferred_element_type=jnp.float32) + bu_ref[...]
    # SiLU gate: g * sigmoid(g) = g / (1 + exp(-g)); exp/div land on the EUP slot.
    h = (g / (1.0 + jnp.exp(-g))) * u                                 # (TM, TI)
    acc_ref[...] += jnp.dot(h.astype(x.dtype), wd_ref[...],
                            preferred_element_type=jnp.float32)

    @pl.when(j == pl.num_programs(1) - 1)
    def _():
        o_ref[...] = (acc_ref[...] + bd_ref[...]).astype(o_ref.dtype)


def gate_mlp_forward(x, w_gate, b_gate, w_up, b_up, w_down, b_down,
                     *, tm=256, ti=256):
    """x: (..., H).  Weights in (in, out) layout:
       w_gate/w_up: (H, I), w_down: (I, H); biases (I,), (I,), (H,).
       Returns (..., H), same dtype as x."""
    orig_shape = x.shape
    H = orig_shape[-1]
    I = w_gate.shape[1]
    assert w_gate.shape == (H, I) and w_up.shape == (H, I) and w_down.shape == (I, H)

    x2 = x.reshape(-1, H)
    M = x2.shape[0]

    # Row tile: clamp to the (8-aligned) row count and pad rows instead of
    # asserting divisibility.  Padded rows are computed and discarded.
    tm = min(tm, max(8, ((M + 7) // 8) * 8))
    m_pad = pl.cdiv(M, tm) * tm
    if m_pad != M:
        x2 = jnp.pad(x2, ((0, m_pad - M), (0, 0)))

    # Intermediate tile: must evenly divide I and be lane-aligned.
    if I % ti != 0 or ti % 128 != 0:
        ti = I

    bg2 = b_gate.reshape(1, I)
    bu2 = b_up.reshape(1, I)
    bd2 = b_down.reshape(1, H)

    grid = (m_pad // tm, I // ti)
    out = pl.pallas_call(
        gate_mlp_kernel,
        out_shape=jax.ShapeDtypeStruct((m_pad, H), x.dtype),
        grid_spec=pltpu.PrefetchScalarGridSpec(
            num_scalar_prefetch=0,
            grid=grid,
            in_specs=[
                pl.BlockSpec((tm, H), lambda i, j: (i, 0)),   # x rows
                pl.BlockSpec((H, ti), lambda i, j: (0, j)),   # w_gate
                pl.BlockSpec((H, ti), lambda i, j: (0, j)),   # w_up
                pl.BlockSpec((ti, H), lambda i, j: (j, 0)),   # w_down
                pl.BlockSpec((1, ti), lambda i, j: (0, j)),   # b_gate
                pl.BlockSpec((1, ti), lambda i, j: (0, j)),   # b_up
                pl.BlockSpec((1, H), lambda i, j: (0, 0)),    # b_down
            ],
            out_specs=pl.BlockSpec((tm, H), lambda i, j: (i, 0)),
            scratch_shapes=[pltpu.VMEM((tm, H), jnp.float32)],
        ),
        compiler_params=pltpu.CompilerParams(
            dimension_semantics=("parallel", "arbitrary"),
            vmem_limit_bytes=64 * 1024 * 1024,
        ),
    )(x2, w_gate, w_up, w_down, bg2, bu2, bd2)

    return out[:M].reshape(orig_shape)


def reference_forward(x, w_gate, b_gate, w_up, b_up, w_down, b_down):
    """Pure-JAX reference mirroring the PyTorch module (act = SiLU)."""
    g = x @ w_gate + b_gate
    u = x @ w_up + b_up
    h = (g / (1.0 + jnp.exp(-g))) * u
    return h @ w_down + b_down


if __name__ == "__main__":
    # Small config: hidden_size H=128, intermediate_size I=256, batch=2, seq=64.
    # TODO(synk): only hidden_act="silu"/"swish" is implemented; the generic
    # ACT2FN lookup of the PyTorch module is not translated.
    B, S, H, I = 2, 64, 128, 256

    key = jax.random.PRNGKey(0)
    kx, kg, ku, kd, kbg, kbu, kbd = jax.random.split(key, 7)

    x = jax.random.normal(kx, (B, S, H), dtype=jnp.float32)
    w_gate = jax.random.normal(kg, (H, I), dtype=jnp.float32) / jnp.sqrt(H)
    w_up = jax.random.normal(ku, (H, I), dtype=jnp.float32) / jnp.sqrt(H)
    w_down = jax.random.normal(kd, (I, H), dtype=jnp.float32) / jnp.sqrt(I)
    b_gate = 0.1 * jax.random.normal(kbg, (I,), dtype=jnp.float32)   # mlp_bias=True
    b_up = 0.1 * jax.random.normal(kbu, (I,), dtype=jnp.float32)
    b_down = 0.1 * jax.random.normal(kbd, (H,), dtype=jnp.float32)

    out = gate_mlp_forward(x, w_gate, b_gate, w_up, b_up, w_down, b_down,
                           tm=64, ti=128)
    out = jax.block_until_ready(out)

    ref = reference_forward(x, w_gate, b_gate, w_up, b_up, w_down, b_down)
    assert out.shape == (B, S, H)
    assert jnp.allclose(out, ref, atol=1e-4, rtol=1e-4)

    print("KERNEL_OK")
</pallas_src>

<mosaic_0001>
module attributes {stable_mosaic.version = 11 : i64} {
  func.func @gate_mlp_kernel(%arg0: i32, %arg1: i32, %arg2: memref<64x128xf32, #tpu.memory_space<vmem>>, %arg3: memref<128x128xf32, #tpu.memory_space<vmem>>, %arg4: memref<128x128xf32, #tpu.memory_space<vmem>>, %arg5: memref<128x128xf32, #tpu.memory_space<vmem>>, %arg6: memref<1x128xf32, #tpu.memory_space<vmem>>, %arg7: memref<1x128xf32, #tpu.memory_space<vmem>>, %arg8: memref<1x128xf32, #tpu.memory_space<vmem>>, %arg9: memref<64x128xf32, #tpu.memory_space<vmem>>, %arg10: memref<64x128xf32, #tpu.memory_space<vmem>>) attributes {dimension_semantics = [#tpu.dimension_semantics<parallel>, #tpu.dimension_semantics<arbitrary>], iteration_bounds = array<i64: 2, 2>, scalar_prefetch = 0 : i64, scratch_operands = 1 : i64, tpu.core_type = #tpu.core_type<tc>, window_params = [{transform_indices = @transform_0, window_bounds = array<i64: 64, 128>}, {transform_indices = @transform_1, window_bounds = array<i64: 128, 128>}, {transform_indices = @transform_2, window_bounds = array<i64: 128, 128>}, {transform_indices = @transform_3, window_bounds = array<i64: 128, 128>}, {transform_indices = @transform_4, window_bounds = array<i64: 1, 128>}, {transform_indices = @transform_5, window_bounds = array<i64: 1, 128>}, {pipeline_mode = #tpu.pipeline_mode<synchronous>, transform_indices = @transform_6, window_bounds = array<i64: 1, 128>}, {transform_indices = @transform_7, window_bounds = array<i64: 64, 128>}]} {
    %c0_i32 = arith.constant 0 : i32
    %0 = arith.cmpi eq, %arg1, %c0_i32 : i32
    %1 = arith.extui %0 : i1 to i32
    %c0_i32_0 = arith.constant 0 : i32
    %2 = arith.cmpi ne, %1, %c0_i32_0 : i32
    scf.if %2 {
      %cst_21 = arith.constant 0.000000e+00 : f32
      %29 = vector.broadcast %cst_21 : f32 to vector<64x128xf32>
      %c0_22 = arith.constant 0 : index
      %c0_23 = arith.constant 0 : index
      %30 = vector.load %arg10[%c0_22, %c0_23] : memref<64x128xf32, #tpu.memory_space<vmem>>, vector<64x128xf32>
      tpu.vector_store %arg10[%c0_22, %c0_23], %29 {strides = array<i32>} : memref<64x128xf32, #tpu.memory_space<vmem>>, vector<64x128xf32>,
    } else {
    }
    %c0 = arith.constant 0 : index
    %c0_1 = arith.constant 0 : index
    %3 = vector.load %arg2[%c0, %c0_1] : memref<64x128xf32, #tpu.memory_space<vmem>>, vector<64x128xf32>
    %c0_2 = arith.constant 0 : index
    %c0_3 = arith.constant 0 : index
    %4 = vector.load %arg3[%c0_2, %c0_3] : memref<128x128xf32, #tpu.memory_space<vmem>>, vector<128x128xf32>
    %cst = arith.constant dense<0.000000e+00> : vector<64x128xf32>
    %5 = tpu.matmul %3, %4, %cst {dimension_numbers = #tpu.dot_dimension_numbers<[1], [0], [0], [1], [0, 0, 1, 1], [], []>} : vector<64x128xf32>, vector<128x128xf32>, vector<64x128xf32> -> vector<64x128xf32>
    %c0_4 = arith.constant 0 : index
    %c0_5 = arith.constant 0 : index
    %6 = vector.load %arg6[%c0_4, %c0_5] : memref<1x128xf32, #tpu.memory_space<vmem>>, vector<1x128xf32>
    %7 = vector.broadcast %6 : vector<1x128xf32> to vector<64x128xf32>
    %8 = arith.addf %5, %7 : vector<64x128xf32>
    %c0_6 = arith.constant 0 : index
    %c0_7 = arith.constant 0 : index
    %9 = vector.load %arg4[%c0_6, %c0_7] : memref<128x128xf32, #tpu.memory_space<vmem>>, vector<128x128xf32>
    %cst_8 = arith.constant dense<0.000000e+00> : vector<64x128xf32>
    %10 = tpu.matmul %3, %9, %cst_8 {dimension_numbers = #tpu.dot_dimension_numbers<[1], [0], [0], [1], [0, 0, 1, 1], [], []>} : vector<64x128xf32>, vector<128x128xf32>, vector<64x128xf32> -> vector<64x128xf32>
    %c0_9 = arith.constant 0 : index
    %c0_10 = arith.constant 0 : index
    %11 = vector.load %arg7[%c0_9, %c0_10] : memref<1x128xf32, #tpu.memory_space<vmem>>, vector<1x128xf32>
    %12 = vector.broadcast %11 : vector<1x128xf32> to vector<64x128xf32>
    %13 = arith.addf %10, %12 : vector<64x128xf32>
    %cst_11 = arith.constant 0.000000e+00 : f32
    %14 = vector.broadcast %cst_11 : f32 to vector<64x128xf32>
    %15 = arith.subf %14, %8 : vector<64x128xf32>
    %16 = math.exp %15 : vector<64x128xf32>
    %cst_12 = arith.constant 1.000000e+00 : f32
    %17 = vector.broadcast %cst_12 : f32 to vector<64x128xf32>
    %18 = arith.addf %17, %16 : vector<64x128xf32>
    %19 = arith.divf %8, %18 : vector<64x128xf32>
    %20 = arith.mulf %19, %13 : vector<64x128xf32>
    %c0_13 = arith.constant 0 : index
    %c0_14 = arith.constant 0 : index
    %21 = vector.load %arg10[%c0_13, %c0_14] : memref<64x128xf32, #tpu.memory_space<vmem>>, vector<64x128xf32>
    %c0_15 = arith.constant 0 : index
    %c0_16 = arith.constant 0 : index
    %22 = vector.load %arg5[%c0_15, %c0_16] : memref<128x128xf32, #tpu.memory_space<vmem>>, vector<128x128xf32>
    %cst_17 = arith.constant dense<0.000000e+00> : vector<64x128xf32>
    %23 = tpu.matmul %20, %22, %cst_17 {dimension_numbers = #tpu.dot_dimension_numbers<[1], [0], [0], [1], [0, 0, 1, 1], [], []>} : vector<64x128xf32>, vector<128x128xf32>, vector<64x128xf32> -> vector<64x128xf32>
    %24 = arith.addf %21, %23 : vector<64x128xf32>
    %c0_18 = arith.constant 0 : index
    %c0_19 = arith.constant 0 : index
    %25 = vector.load %arg10[%c0_18, %c0_19] : memref<64x128xf32, #tpu.memory_space<vmem>>, vector<64x128xf32>
    tpu.vector_store %arg10[%c0_18, %c0_19], %24 {strides = array<i32>} : memref<64x128xf32, #tpu.memory_space<vmem>>, vector<64x128xf32>,
    %c1_i32 = arith.constant 1 : i32
    %26 = arith.cmpi eq, %arg1, %c1_i32 : i32
    %27 = arith.extui %26 : i1 to i32
    %c0_i32_20 = arith.constant 0 : i32
    %28 = arith.cmpi ne, %27, %c0_i32_20 : i32
    scf.if %28 {
      %c0_21 = arith.constant 0 : index
      %c0_22 = arith.constant 0 : index
      %29 = vector.load %arg10[%c0_21, %c0_22] : memref<64x128xf32, #tpu.memory_space<vmem>>, vector<64x128xf32>
      %c0_23 = arith.constant 0 : index
      %c0_24 = arith.constant 0 : index
      %30 = vector.load %arg8[%c0_23, %c0_24] : memref<1x128xf32, #tpu.memory_space<vmem>>, vector<1x128xf32>
      %31 = vector.broadcast %30 : vector<1x128xf32> to vector<64x128xf32>
      %32 = arith.addf %29, %31 : vector<64x128xf32>
      %c0_25 = arith.constant 0 : index
      %c0_26 = arith.constant 0 : index
      %33 = vector.load %arg9[%c0_25, %c0_26] : memref<64x128xf32, #tpu.memory_space<vmem>>, vector<64x128xf32>
      tpu.vector_store %arg9[%c0_25, %c0_26], %32 {strides = array<i32>} : memref<64x128xf32, #tpu.memory_space<vmem>>, vector<64x128xf32>,
    } else {
    }
    return
  }
  func.func @transform_0(%arg0: i32, %arg1: i32) -> (i32, i32) {
    %c0_i32 = arith.constant 0 : i32
    %c0_i32_0 = arith.constant 0 : i32
    return %arg0, %c0_i32 : i32, i32
  }
  func.func @transform_1(%arg0: i32, %arg1: i32) -> (i32, i32) {
    %c0_i32 = arith.constant 0 : i32
    %c0_i32_0 = arith.constant 0 : i32
    return %c0_i32, %arg1 : i32, i32
  }
  func.func @transform_2(%arg0: i32, %arg1: i32) -> (i32, i32) {
    %c0_i32 = arith.constant 0 : i32
    %c0_i32_0 = arith.constant 0 : i32
    return %c0_i32, %arg1 : i32, i32
  }
  func.func @transform_3(%arg0: i32, %arg1: i32) -> (i32, i32) {
    %c0_i32 = arith.constant 0 : i32
    %c0_i32_0 = arith.constant 0 : i32
    return %arg1, %c0_i32 : i32, i32
  }
  func.func @transform_4(%arg0: i32, %arg1: i32) -> (i32, i32) {
    %c0_i32 = arith.constant 0 : i32
    %c0_i32_0 = arith.constant 0 : i32
    return %c0_i32, %arg1 : i32, i32
  }
  func.func @transform_5(%arg0: i32, %arg1: i32) -> (i32, i32) {
    %c0_i32 = arith.constant 0 : i32
    %c0_i32_0 = arith.constant 0 : i32
    return %c0_i32, %arg1 : i32, i32
  }
  func.func @transform_6(%arg0: i32, %arg1: i32) -> (i32, i32) {
    %c0_i32 = arith.constant 0 : i32
    %c0_i32_0 = arith.constant 0 : i32
    %c0_i32_1 = arith.constant 0 : i32
    return %c0_i32, %c0_i32_0 : i32, i32
  }
  func.func @transform_7(%arg0: i32, %arg1: i32) -> (i32, i32) {
    %c0_i32 = arith.constant 0 : i32
    %c0_i32_0 = arith.constant 0 : i32
    return %arg0, %c0_i32 : i32, i32
  }
}

</mosaic_0001>

<bundles_post_ra>
// kernel: tpu_custom_call.1
= control target key start
LH: loop header
LB: loop body
LE: loop exit
PB: predicated region body
PF: predicated region fallthrough
CT: control target
= control target key end

     0   :  { %s2769_s0 = inlined_call_operand.hbm [shape: f32[128,128], index: 0, kind: input, shape index: {}]   ;;  %s2770_s1 = inlined_call_operand.hbm [shape: f32[128,256], index: 1, kind: input, shape index: {}]   ;;  %s2771_s2 = inlined_call_operand.hbm [shape: f32[128,256], index: 2, kind: input, shape index: {}]   ;;  %s2772_s3 = inlined_call_operand.hbm [shape: f32[256,128], index: 3, kind: input, shape index: {}]   ;;  %s2773_s4 = inlined_call_operand.hbm [shape: f32[1,256], index: 4, kind: input, shape index: {}]   ;;  %s2774_s5 = inlined_call_operand.hbm [shape: f32[1,256], index: 5, kind: input, shape index: {}]   ;;  %s2775_s6 = inlined_call_operand.hbm [shape: f32[1,128], index: 6, kind: input, shape index: {}]   ;;  %s2776_s7 = inlined_call_operand.hbm [shape: f32[128,128], index: 7, kind: output, shape index: {}]  }
   0x1   :  { %2807 = sst [smem:[#allocation33_spill]] %s2769_s0 }
   0x2   :  { %2808 = sst [smem:[#allocation34_spill]] %s2770_s1 }
   0x3   :  { %2809 = sst [smem:[#allocation35_spill]] %s2772_s3 }
   0x4   :  { %2810 = sst [smem:[#allocation36_spill]] %s2774_s5 }
   0x5   :  { %2811 = sst [smem:[#allocation37_spill]] %s2775_s6 }
   0x6   :  { %2812 = sst [smem:[#allocation38_spill]] %s2776_s7 }
   0x7   :  { %12 = vsyncpa [#allocation4], 0 }
   0x8   :  { %14 = vsyncpa [#allocation4 + $0x1], 0 }
   0x9   :  { %15 = vsyncpa [#allocation7], 0 }
   0xa   :  { %17 = vsyncpa [#allocation7 + $0x1], 0 }
   0xb   :  { %18 = vsyncpa [#allocation10], 0 }
   0xc   :  { %20 = vsyncpa [#allocation10 + $0x1], 0 }
   0xd   :  { %21 = vsyncpa [#allocation13], 0 }
   0xe   :  { %23 = vsyncpa [#allocation13 + $0x1], 0 }
   0xf   :  { %24 = vsyncpa [#allocation5], 0 }
  0x10   :  { %26 = vsyncpa [#allocation5 + $0x1], 0  ;;  %s2157_s24 = smov 0   ;;  %s2159_s25 = smov 0  }
  0x11   :  { %s2161_s26 = smov 0   ;;  %s2163_s27 = smov 0  }
  0x12   :  { %s2165_s28 = smov 0   ;;  %s2167_s29 = smov 0  }
  0x13   :  { %s2169_s30 = smov 0   ;;  %s2171_s8 = smov 0  }
  0x14   :  { %s2173_s9 = smov 0   ;;  %s2175_s10 = smov 0  }
  0x15   :  { %s2177_s11 = smov 0  }
  0x16 LB: > { %2813 = sst [smem:[#allocation22_spill]] %s2065_s25  ;;  %s2211_s12 = sadd.s32 4294967295, %s2101_s11   ;;  %s2101_s11 = sphi %s2177_s11, %s32_s11   ;;  %s2097_s10 = sphi %s2175_s10, %s2887_s10   ;;  %s2093_s9 = sphi %s2173_s9, %s2886_s9   ;;  %s2089_s8 = sphi %s2171_s8, %s2885_s8   ;;  %s2085_s30 = sphi %s2169_s30, %s2884_s30   ;;  %s2081_s29 = sphi %s2167_s29, %s2883_s29   ;;  %s2077_s28 = sphi %s2165_s28, %s2882_s28   ;;  %s2073_s27 = sphi %s2163_s27, %s2881_s27   ;;  %s2069_s26 = sphi %s2161_s26, %s2880_s26   ;;  %s2065_s25 = sphi %s2159_s25, %s2879_s25   ;;  %s2061_s24 = sphi %s2157_s24, %s2877_s24  }
  0x17   : > { %2814 = sst [smem:[#allocation23_spill]] %s2073_s27  ;;  %s1227_s13 = sadd.s32 4294967294, %s2101_s11  }
  0x18   : > { %2815 = sst [smem:[#allocation24_spill]] %s2077_s28  ;;  %p58_p0 = scmp.ne.s32.totalorder %s2081_s29, %s2077_s28 }
  0x19   : > { %2816 = sst [smem:[#allocation25_spill]] %s2085_s30  ;;  %p59_p1 = scmp.eq.s32.totalorder %s2101_s11, 0 }
  0x1a   : > { %2817 = sst [smem:[#allocation26_spill]] %s2089_s8  ;;  %p64_p2 = scmp.ne.s32.totalorder %s2077_s28, %s2073_s27 }
  0x1b   : > { %2818 = sst [smem:[#allocation27_spill]] %s2211_s12  ;;  %p2783_p3 = scmp.eq.s32.totalorder %s2211_s12, 0 }
  0x1c   : > { %p2225_p4 = por %p59_p1, %p58_p0  ;;  %p84_p5 = scmp.ne.s32.totalorder %s2069_s26, %s2065_s25 }
  0x1d   : > { %p2236_p6 = por %p2783_p3, %p64_p2  ;;  %p90_p7 = scmp.ne.s32.totalorder %s2065_s25, %s2061_s24 }
  0x1e   : > { %s2819_s16 = scalar_select %p2225_p4, 1, 0 }
  0x1f   : > { %s2820_s17 = scalar_select %p2236_p6, 1, 0 }
  0x20   : > { %p2241_p8 = por %p84_p5, %p59_p1  ;;  %p239_p9 = scmp.eq.s32.totalorder %s2211_s12, 3 }
  0x21   : > { %2821 = sst [smem:[#allocation28_spill]] %s2820_s17  ;;  %p2248_p10 = por %p90_p7, %p2783_p3 }
  0x22   : > { %p245_p11 = scmp.eq.s32.totalorder %s1227_s13, 3  ;;  %p2255_p12 = por %p239_p9, %p58_p0 }
  0x23   : > { %s2823_s19 = scalar_select %p2248_p10, 1, 0 }
  0x24   : > { %s2825_s20 = scalar_select %p2255_p12, 1, 0 }
  0x25   : > { %2824 = sst [smem:[#allocation29_spill]] %s2823_s19  ;;  %p1228_p13 = scmp.ge.s32.totalorder %s2101_s11, 1 }
  0x26   : > { %2826 = sst [smem:[#allocation30_spill]] %s2825_s20  ;;  %p2263_p6 = por %p245_p11, %p64_p2 }
  0x27   : > { %p252_p1 = scmp.lt.s32.totalorder %s2101_s11, 5  ;;  %s2103_s23 = smov [#allocation14]  }
  0x28   : > { %s2827_s21 = scalar_select %p2263_p6, 1, 0 }
  0x29   : > { %p2268_p5 = pnand %p1228_p13, %p252_p1  ;;  %s265_s24 = sshll.u32 %s2103_s23, 4  ;;  %s266_s24 = int_to_ptr.vmem [resolvable:$true] %s265_s24 }
  0x2a   : > { %2828 = sst [smem:[#allocation31_spill]] %s2827_s21  ;;  %p2784_p7 = scmp.lt.s32.totalorder %s2101_s11, 4 }
  0x2b   : > { %s2829_s22 = scalar_select %p2268_p5, 1, 0 }
  0x2c   : > { %p1597_p0 = pneg %p2268_p5  ;;  %p2285_p2 = pnand %p2784_p7, %p2241_p8 }
  0x2d   : > { %2830 = sst [smem:[#allocation32_spill]] %s2829_s22  ;;  %s2833_s6 = sld [smem:[#allocation37_spill]] }
  0x2e   : > { %p2277_p9 = pnand %p1597_p0, %p2783_p3 }
  0x2f   : > { %s2832_s14 = scalar_select %p2285_p2, 1, 0 }
  0x30   : > { %p1757_p13 = pneg %p2277_p9 }
  0x33   : > { %s1755_s23 = scalar_lea.hbm %s2833_s6, 16 }
  0x34   : > { %p1756_p11 = scmp.ne.s32.totalorder %s2833_s6, %s1755_s23  ;;  %p1762_p3 = scmp.lt.u32.totalorder %s1755_s23, %s2833_s6 }
  0x36   : > { %p1758_p1 = pnand %p1757_p13, %p1756_p11 }
  0x38   : > { %p1759_p0 = pneg %p1758_p1 }
  0x3a   : > { %p1764_p8 = pnand %p1762_p3, %p1759_p0 }
  0x3c   : > { %1767 = shalt.err (!%p1764_p8)
}
  0x3d   : > { %s1768_s8 = scalar_lea.vmem %s266_s24, 16  ;;  %s1775_s15 = scalar_lea.vmem %s266_s24, 32 }
  0x3e   : > { %p1769_p7 = scmp.ne.s32.totalorder %s266_s24, %s1768_s8  ;;  %p1776_p10 = scmp.lt.s32.totalorder %s266_s24, %s266_s24 }
  0x3f   : > { %p1777_p5 = scmp.lt.s32.totalorder %s1775_s15, %s1768_s8 }
  0x40   : > { %p1771_p6 = pnand %p1769_p7, %p1757_p13 }
  0x41   : > { %p1778_p4 = por %p1777_p5, %p1776_p10 }
  0x42   : > { %p1772_p12 = pneg %p1771_p6 }
  0x44   : > { %p1779_p2 = pnand %p1778_p4, %p1772_p12 }
  0x46   : > { %1782 = shalt.err (!%p1779_p2)
}
  0x47   : > { %1600 = dma.hbm_to_vmem [thread:$0]  (!%p2277_p9), %s2833_s6, 16, %s266_s24, [#allocation13]  }
  0x48   : > { %s2306_s20 = sand.u32 1, %s2101_s11   ;;  %s2309_s21 = sand.u32 1, %s2069_s26  }
  0x49   : > { %s2312_s8 = sshll.u32 %s2309_s21, 7  ;;  %s2789_s23 = sshll.u32 %s2093_s9, 7 }
  0x4a   : > { %s2834_s1 = sld [smem:[#allocation34_spill]]  ;;  %s301_s24 = scalar_lea.vmem [#allocation6], %s2312_s8 }
  0x4b   : > { %s307_s7 = sshll.u32 %s301_s24, 4  ;;  %p2835_p4 = scmp.ne.s32.totalorder %s2832_s14, 0  ;;  %s2323_s7 = int_to_ptr.vmem [resolvable:$true] %s307_s7 }
  0x4d   : > { %p2330_p6 = pneg %p2835_p4 }
  0x50   : > { %s2320_s15 = scalar_lea.hbm %s2834_s1, %s2789_s23  ;;  %s1788_s23 = scalar_lea.hbm %s2834_s1, 4096 }
  0x51   : > { %s1783_s6 = scalar_lea.hbm %s2320_s15, 2048  ;;  %p1789_p5 = scmp.lt.u32.totalorder %s2320_s15, %s2834_s1 }
  0x52   : > { %p1784_p3 = scmp.ne.s32.totalorder %s2320_s15, %s1783_s6  ;;  %p1790_p7 = scmp.lt.u32.totalorder %s1788_s23, %s1783_s6 }
  0x53   : > { %p1792_p2 = scmp.lt.u32.totalorder %s1783_s6, %s2320_s15 }
  0x54   : > { %p1786_p10 = pnand %p2330_p6, %p1784_p3  ;;  %p1791_p9 = por %p1790_p7, %p1789_p5 }
  0x56   : > { %p1787_p12 = pneg %p1786_p10  ;;  %p1793_p11 = por %p1792_p2, %p1791_p9 }
  0x58   : > { %p1794_p13 = pnand %p1793_p11, %p1787_p12 }
  0x5a   : > { %1797 = shalt.err (!%p1794_p13)
}
  0x5b   : > { %s1798_s27 = scalar_lea.vmem %s2323_s7, 2048  ;;  %s2104_s13 = smov [#allocation6]  }
  0x5c   : > { %p1799_p1 = scmp.ne.s32.totalorder %s2323_s7, %s1798_s27  ;;  %s1803_s18 = sshll.u32 %s2104_s13, 4  ;;  %s1804_s18 = int_to_ptr.vmem [resolvable:$false] %s1803_s18 }
  0x5d   : > { %s1805_s19 = scalar_lea.vmem %s1804_s18, 4096  ;;  %p1806_p3 = scmp.lt.s32.totalorder %s2323_s7, %s1804_s18 }
  0x5e   : > { %p1801_p0 = pnand %p1799_p1, %p2330_p6  ;;  %p1807_p10 = scmp.lt.s32.totalorder %s1805_s19, %s1798_s27 }
  0x60   : > { %p1802_p8 = pneg %p1801_p0  ;;  %p1808_p5 = por %p1807_p10, %p1806_p3 }
  0x62   : > { %p1809_p7 = pnand %p1808_p5, %p1802_p8 }
  0x64   : > { %1812 = shalt.err (!%p1809_p7)
}
  0x65   : > { %s2801_s6 = smov 256   ;;  %s2802_s23 = smov 128  }
  0x66   : > { %s2804_s24 = smov 8   ;;  %s2837_s27 = scalar_lea.sflag [#allocation7], %s2306_s20 }
  0x67   : > { %1607 = dma.hbm_to_vmem [thread:$0]  (!%p2835_p4), %s2320_s15, 2048, %s2323_s7, %s2837_s27, %s2801_s6, %s2802_s23, %s2804_s24  }
  0x68   : > { %s2838_s13 = sshll.u32 %s2093_s9, 7  ;;  %s1261_s25 = sshll.u32 %s2093_s9, 11 }
  0x69   : > { %s2363_s1 = scalar_lea.hbm %s2771_s2, %s2838_s13  ;;  %s2839_s3 = sld [smem:[#allocation35_spill]] }
  0x6a   : > { %s341_s22 = scalar_lea.vmem [#allocation9], %s2312_s8  ;;  %s2800_s15 = scalar_lea.sflag [#allocation10], %s2306_s20 }
  0x6b   : > { %s348_s5 = sshll.u32 %s341_s22, 4  ;;  %s2372_s5 = int_to_ptr.vmem [resolvable:$true] %s348_s5 }
  0x6f   : > { %s2369_s28 = scalar_lea.hbm %s2839_s3, %s1261_s25  ;;  %s1818_s12 = scalar_lea.hbm %s2839_s3, 4096 }
  0x70   : > { %s1813_s7 = scalar_lea.hbm %s2369_s28, 2048  ;;  %p1819_p11 = scmp.lt.u32.totalorder %s2369_s28, %s2839_s3 }
  0x71   : > { %p1814_p12 = scmp.ne.s32.totalorder %s2369_s28, %s1813_s7  ;;  %p1820_p13 = scmp.lt.u32.totalorder %s1818_s12, %s1813_s7 }
  0x72   : > { %p1822_p0 = scmp.lt.u32.totalorder %s1813_s7, %s2369_s28 }
  0x73   : > { %p1816_p9 = pnand %p1814_p12, %p2330_p6  ;;  %p1821_p1 = por %p1820_p13, %p1819_p11 }
  0x75   : > { %p1817_p2 = pneg %p1816_p9  ;;  %p1823_p8 = por %p1822_p0, %p1821_p1 }
  0x77   : > { %p1824_p3 = pnand %p1823_p8, %p1817_p2 }
  0x79   : > { %1827 = shalt.err (!%p1824_p3)
}
  0x7a   : > { %s1828_s22 = scalar_lea.vmem %s2372_s5, 2048  ;;  %s2108_s18 = smov [#allocation9]  }
  0x7b   : > { %p1829_p10 = scmp.ne.s32.totalorder %s2372_s5, %s1828_s22  ;;  %s1833_s19 = sshll.u32 %s2108_s18, 4  ;;  %s1834_s19 = int_to_ptr.vmem [resolvable:$false] %s1833_s19 }
  0x7c   : > { %s1835_s27 = scalar_lea.vmem %s1834_s19, 4096  ;;  %p1836_p12 = scmp.lt.s32.totalorder %s2372_s5, %s1834_s19 }
  0x7d   : > { %p1831_p5 = pnand %p1829_p10, %p2330_p6  ;;  %p1837_p9 = scmp.lt.s32.totalorder %s1835_s27, %s1828_s22 }
  0x7f   : > { %p1832_p7 = pneg %p1831_p5  ;;  %p1838_p11 = por %p1837_p9, %p1836_p12 }
  0x81   : > { %p1839_p13 = pnand %p1838_p11, %p1832_p7 }
  0x83   : > { %1842 = shalt.err (!%p1839_p13)
}
  0x84   : > { %1613 = dma.hbm_to_vmem [thread:$0]  (!%p2835_p4), %s2369_s28, 2048, %s2372_s5, %s2800_s15, %s2802_s23, %s2802_s23, %s2804_s24  }
  0x85   : > { %s41_s7 = sadd.s32 1, %s2093_s9  ;;  %s44_s13 = sadd.s32 1, %s2097_s10 }
  0x86   : > { %p42_p2 = scmp.ge.s32.totalorder %s41_s7, 2  ;;  %s276_s12 = sand.u32 1, %s2081_s29  }
  0x87   : > { %s1260_s25 = sshll.u32 %s2097_s10, 10  ;;  %s1231_s22 = sshll.u32 %s276_s12, 6 }
  0x88   : > { %s2889_s7 = smov (%p42_p2, %s41_s7), 0  ;;  %s2891_s13 = smov (!%p42_p2, %s44_s13), %s2097_s10 }
  0x89   : > { %s74_s17 = ssub.s32 %s2093_s9, %s2889_s7  ;;  %p46_p1 = scmp.ge.s32.totalorder %s2891_s13, 2 }
  0x8a   : > { %p75_p0 = scmp.eq.s32.totalorder %s74_s17, 0  ;;  %s2840_s0 = sld [smem:[#allocation33_spill]] }
  0x8b   : > { %s2893_s13 = smov (%p46_p1, %s2891_s13), 0  ;;  %s2841_s28 = sadd.s32 1, %s2069_s26 }
  0x8c   : > { %s2420_s27 = scalar_select %p75_p0, %s2069_s26, %s2841_s28  }
  0x8d   : > { %s48_s15 = ssub.s32 %s2097_s10, %s2893_s13  ;;  %s280_s6 = scalar_lea.vmem [#allocation3], %s1231_s22 }
  0x8e   : > { %p49_p8 = scmp.eq.s32.totalorder %s48_s15, 0  ;;  %s287_s17 = sshll.u32 %s280_s6, 4  ;;  %s2424_s17 = int_to_ptr.vmem [resolvable:$true] %s287_s17 }
  0x8f   : > { %p2842_p3 = scmp.ne.s32.totalorder %s2819_s16, 0  ;;  %p2843_p10 = scmp.lt.s32.totalorder %s2101_s11, 4 }
  0x90   : > { %s2413_s5 = scalar_lea.hbm %s2840_s0, %s1260_s25  ;;  %s2845_s18 = sadd.s32 1, %s2081_s29 }
  0x91   : > { %p2430_p5 = pnand %p2843_p10, %p2842_p3  ;;  %s2439_s28 = scalar_lea.sflag [#allocation4], %s276_s12 }
  0x92   : > { %s2437_s19 = scalar_select %p49_p8, %s2081_s29, %s2845_s18  }
  0x93   : > { %s1843_s23 = scalar_lea.hbm %s2413_s5, 1024  ;;  %p1845_p12 = pneg %p2430_p5 }
  0x94   : > { %p1844_p7 = scmp.ne.s32.totalorder %s2413_s5, %s1843_s23  ;;  %s1848_s15 = scalar_lea.hbm %s2840_s0, 2048 }
  0x95   : > { %p1849_p13 = scmp.lt.u32.totalorder %s2413_s5, %s2840_s0  ;;  %p1850_p2 = scmp.lt.u32.totalorder %s1848_s15, %s1843_s23 }
  0x96   : > { %p1846_p9 = pnand %p1845_p12, %p1844_p7  ;;  %p1852_p0 = scmp.lt.u32.totalorder %s1843_s23, %s2413_s5 }
  0x97   : > { %p1851_p1 = por %p1850_p2, %p1849_p13 }
  0x98   : > { %p1847_p11 = pneg %p1846_p9 }
  0x99   : > { %p1853_p8 = por %p1852_p0, %p1851_p1 }
  0x9b   : > { %p1854_p3 = pnand %p1853_p8, %p1847_p11 }
  0x9d   : > { %1857 = shalt.err (!%p1854_p3)
}
  0x9e   : > { %s1858_s12 = scalar_lea.vmem %s2424_s17, 1024  ;;  %s2109_s18 = smov [#allocation3]  }
  0x9f   : > { %p1859_p10 = scmp.ne.s32.totalorder %s2424_s17, %s1858_s12  ;;  %s1863_s16 = sshll.u32 %s2109_s18, 4  ;;  %s1864_s16 = int_to_ptr.vmem [resolvable:$false] %s1863_s16 }
  0xa0   : > { %s1865_s24 = scalar_lea.vmem %s1864_s16, 2048  ;;  %p1866_p4 = scmp.lt.s32.totalorder %s2424_s17, %s1864_s16 }
  0xa1   : > { %p1861_p7 = pnand %p1859_p10, %p1845_p12  ;;  %p1867_p13 = scmp.lt.s32.totalorder %s1865_s24, %s1858_s12 }
  0xa3   : > { %p1862_p9 = pneg %p1861_p7  ;;  %p1868_p2 = por %p1867_p13, %p1866_p4 }
  0xa5   : > { %p1869_p1 = pnand %p1868_p2, %p1862_p9 }
  0xa7   : > { %1872 = shalt.err (!%p1869_p1)
}
  0xa8   : > { %s2846_s23 = smov 8   ;;  %s2847_s6 = smov 128  }
  0xa9   : > { %1604 = dma.hbm_to_vmem [thread:$0]  (!%p2430_p5), %s2413_s5, 1024, %s2424_s17, %s2439_s28, %s2847_s6, %s2847_s6, %s2846_s23  }
  0xaa   : > { %s321_s15 = scalar_lea.vmem [#allocation8], %s2312_s8  ;;  %s1241_s12 = sshll.u32 %s2093_s9, 4 }
  0xab   : > { %s327_s22 = sshll.u32 %s321_s15, 4  ;;  %s1873_s25 = scalar_lea.hbm %s2363_s1, 2048  ;;  %s2471_s22 = int_to_ptr.vmem [resolvable:$true] %s327_s22 }
  0xac   : > { %p1874_p4 = scmp.ne.s32.totalorder %s2363_s1, %s1873_s25  ;;  %s1878_s24 = scalar_lea.hbm %s2771_s2, 4096 }
  0xad   : > { %p1879_p0 = scmp.lt.u32.totalorder %s2363_s1, %s2771_s2  ;;  %p1880_p8 = scmp.lt.u32.totalorder %s1878_s24, %s1873_s25 }
  0xae   : > { %p1876_p12 = pnand %p1874_p4, %p2330_p6  ;;  %p1882_p3 = scmp.lt.u32.totalorder %s1873_s25, %s2363_s1 }
  0xaf   : > { %p1881_p5 = por %p1880_p8, %p1879_p0 }
  0xb0   : > { %p1877_p11 = pneg %p1876_p12 }
  0xb1   : > { %p1883_p10 = por %p1882_p3, %p1881_p5 }
  0xb3   : > { %p1884_p7 = pnand %p1883_p10, %p1877_p11 }
  0xb5   : > { %1887 = shalt.err (!%p1884_p7)
}
  0xb6   : > { %s1888_s8 = scalar_lea.vmem %s2471_s22, 2048  ;;  %s2110_s5 = smov [#allocation8]  }
  0xb7   : > { %p1889_p9 = scmp.ne.s32.totalorder %s2471_s22, %s1888_s8  ;;  %s1893_s17 = sshll.u32 %s2110_s5, 4  ;;  %s1894_s17 = int_to_ptr.vmem [resolvable:$false] %s1893_s17 }
  0xb8   : > { %s1895_s0 = scalar_lea.vmem %s1894_s17, 4096  ;;  %p1896_p1 = scmp.lt.s32.totalorder %s2471_s22, %s1894_s17 }
  0xb9   : > { %p1891_p13 = pnand %p1889_p9, %p2330_p6  ;;  %p1897_p4 = scmp.lt.s32.totalorder %s1895_s0, %s1888_s8 }
  0xbb   : > { %p1892_p2 = pneg %p1891_p13  ;;  %p1898_p12 = por %p1897_p4, %p1896_p1 }
  0xbd   : > { %p1899_p0 = pnand %p1898_p12, %p1892_p2 }
  0xbf   : > { %1902 = shalt.err (!%p1899_p0)
}
  0xc0   : > { %p2848_p11 = scmp.ne.s32.totalorder %s2832_s14, 0  ;;  %s2849_s3 = smov 256  }
  0xc1   : > { %s2850_s28 = scalar_lea.sflag [#allocation7], %s2306_s20  ;;  %s2505_s18 = scalar_lea.hbm %s2773_s4, %s1241_s12 }
  0xc2   : > { %1610 = dma.hbm_to_vmem [thread:$0]  (!%p2848_p11), %s2363_s1, 2048, %s2471_s22, %s2850_s28, %s2849_s3, %s2847_s6, %s2846_s23  }
  0xc3   : > { %s361_s16 = scalar_lea.vmem [#allocation11], %s2309_s21  ;;  %s1903_s8 = scalar_lea.hbm %s2505_s18, 16 }
  0xc4   : > { %s368_s24 = sshll.u32 %s361_s16, 4  ;;  %p1904_p8 = scmp.ne.s32.totalorder %s2505_s18, %s1903_s8  ;;  %s369_s24 = int_to_ptr.vmem [resolvable:$true] %s368_s24 }
  0xc5   : > { %s1908_s23 = scalar_lea.hbm %s2773_s4, 32  ;;  %p1909_p10 = scmp.lt.u32.totalorder %s2505_s18, %s2773_s4 }
  0xc6   : > { %p1906_p5 = pnand %p1904_p8, %p2330_p6  ;;  %p1910_p7 = scmp.lt.u32.totalorder %s1908_s23, %s1903_s8 }
  0xc7   : > { %p1912_p13 = scmp.lt.u32.totalorder %s1903_s8, %s2505_s18 }
  0xc8   : > { %p1907_p3 = pneg %p1906_p5  ;;  %p1911_p9 = por %p1910_p7, %p1909_p10 }
  0xca   : > { %p1913_p2 = por %p1912_p13, %p1911_p9 }
  0xcc   : > { %p1914_p1 = pnand %p1913_p2, %p1907_p3 }
  0xce   : > { %1917 = shalt.err (!%p1914_p1)
}
  0xcf   : > { %s1918_s17 = scalar_lea.vmem %s369_s24, 16  ;;  %s2111_s0 = smov [#allocation11]  }
  0xd0   : > { %p1919_p4 = scmp.ne.s32.totalorder %s369_s24, %s1918_s17  ;;  %s1923_s3 = sshll.u32 %s2111_s0, 4  ;;  %s1924_s3 = int_to_ptr.vmem [resolvable:$false] %s1923_s3 }
  0xd1   : > { %s1925_s28 = scalar_lea.vmem %s1924_s3, 32  ;;  %p1926_p8 = scmp.lt.s32.totalorder %s369_s24, %s1924_s3 }
  0xd2   : > { %p1921_p12 = pnand %p1919_p4, %p2330_p6  ;;  %p1927_p5 = scmp.lt.s32.totalorder %s1925_s28, %s1918_s17 }
  0xd4   : > { %p1922_p0 = pneg %p1921_p12  ;;  %p1928_p11 = por %p1927_p5, %p1926_p8 }
  0xd6   : > { %p1929_p7 = pnand %p1928_p11, %p1922_p0 }
  0xd8   : > { %1932 = shalt.err (!%p1929_p7)
}
  0xd9   : > { %p2851_p10 = scmp.ne.s32.totalorder %s2832_s14, 0  ;;  %s2852_s15 = scalar_lea.sflag [#allocation10], %s2306_s20 }
  0xda   : > { %s2853_s8 = sld [smem:[#allocation36_spill]]  ;;  %s378_s23 = scalar_lea.vmem [#allocation12], %s2309_s21 }
  0xdb   : > { %1616 = dma.hbm_to_vmem [thread:$0]  (!%p2851_p10), %s2505_s18, 16, %s369_s24, %s2852_s15  }
  0xdc   : > { %s385_s6 = sshll.u32 %s378_s23, 4  ;;  %s376_s22 = scalar_lea.sflag [#allocation13], %s2306_s20  ;;  %s386_s6 = int_to_ptr.vmem [resolvable:$true] %s385_s6 }
  0xe0   : > { %s2854_s5 = smov %s2853_s8  ;;  %s2532_s1 = scalar_lea.hbm %s2853_s8, %s1241_s12 }
  0xe1   : > { %s1933_s17 = scalar_lea.hbm %s2532_s1, 16  ;;  %s1938_s0 = scalar_lea.hbm %s2854_s5, 32 }
  0xe2   : > { %p1934_p11 = scmp.ne.s32.totalorder %s2532_s1, %s1933_s17  ;;  %p1939_p13 = scmp.lt.u32.totalorder %s2532_s1, %s2854_s5 }
  0xe3   : > { %p1940_p2 = scmp.lt.u32.totalorder %s1938_s0, %s1933_s17  ;;  %p1942_p4 = scmp.lt.u32.totalorder %s1933_s17, %s2532_s1 }
  0xe4   : > { %p1936_p3 = pnand %p1934_p11, %p2330_p6 }
  0xe5   : > { %p1941_p1 = por %p1940_p2, %p1939_p13 }
  0xe6   : > { %p1937_p9 = pneg %p1936_p3 }
  0xe7   : > { %p1943_p12 = por %p1942_p4, %p1941_p1 }
  0xe9   : > { %p1944_p0 = pnand %p1943_p12, %p1937_p9 }
  0xeb   : > { %1947 = shalt.err (!%p1944_p0)
}
  0xec   : > { %s1948_s20 = scalar_lea.vmem %s386_s6, 16  ;;  %s2112_s21 = smov [#allocation12]  }
  0xed   : > { %p1949_p8 = scmp.ne.s32.totalorder %s386_s6, %s1948_s20  ;;  %s1953_s28 = sshll.u32 %s2112_s21, 4  ;;  %s1954_s28 = int_to_ptr.vmem [resolvable:$false] %s1953_s28 }
  0xee   : > { %s1955_s15 = scalar_lea.vmem %s1954_s28, 32  ;;  %p1956_p11 = scmp.lt.s32.totalorder %s386_s6, %s1954_s28 }
  0xef   : > { %p1951_p5 = pnand %p1949_p8, %p2330_p6  ;;  %p1957_p3 = scmp.lt.s32.totalorder %s1955_s15, %s1948_s20 }
  0xf1   : > { %p1952_p7 = pneg %p1951_p5  ;;  %p1958_p10 = por %p1957_p3, %p1956_p11 }
  0xf3   : > { %p1959_p2 = pnand %p1958_p10, %p1952_p7 }
  0xf5   : > { %1962 = shalt.err (!%p1959_p2)
}
  0xf6   : > { %p2855_p13 = scmp.ne.s32.totalorder %s2832_s14, 0  ;;  %s2856_s25 = sld [smem:[#allocation32_spill]] }
  0xf8   : > { %1619 = dma.hbm_to_vmem [thread:$0]  (!%p2855_p13), %s2532_s1, 16, %s386_s6, %s376_s22  }
  0xfc   : > { %p2857_p9 = scmp.ne.s32.totalorder %s2856_s25, 0 }
  0xfd   : > { %s2858_s16 = sld [smem:[#allocation24_spill]] (!%p2857_p9)  ;;  %s2859_s30 = sld [smem:[#allocation28_spill]] (!%p2857_p9) }
  0xfe   : > { %394 = sbr.rel (%p2857_p9) target bundleno = 849 (0x351), region = 48 }
 0x103   : > { %s2556_s8 = sand.u32 (!%p2857_p9), 1, %s2858_s16   ;;  %p2860_p6 = scmp.ne.s32.totalorder (!%p2857_p9), %s2859_s30, 0 }
 0x104   : > { %s1244_s23 = sshll.u32 (!%p2857_p9), %s2556_s8, 6  ;;  %s397_s17 = scalar_lea.sflag (!%p2857_p9), [#allocation4], %s2556_s8 }
 0x105   : > { %s2560_s18 = scalar_lea.vmem [#allocation3], %s1244_s23 }
 0x106   : > { %2036 = dma.done.wait (%p2860_p6), %s397_s17, 1024  }
 0x107   : > { %2038 = vsyncadd (%p2860_p6), %s397_s17, 4294966272  ;;  %s2861_s14 = sld [smem:[#allocation27_spill]]  ;;  %s2862_s1 = sld [smem:[#allocation22_spill]] }
 0x108   : > { %s2863_s6 = sld [smem:[#allocation29_spill]] }
 0x10d   : > { %s405_s22 = sand.u32 1, %s2861_s14   ;;  %s2568_s24 = sand.u32 1, %s2862_s1  }
 0x10e   : > { %s1245_s0 = sshll.u32 %s2568_s24, 7  ;;  %s406_s3 = scalar_lea.sflag [#allocation7], %s405_s22 }
 0x10f   : > { %s2571_s12 = scalar_lea.vmem [#allocation6], %s1245_s0  ;;  %p2864_p10 = scmp.ne.s32.totalorder %s2863_s6, 0 }
 0x111   : > { %2040 = dma.done.wait (%p2864_p10), %s406_s3, 4096  }
 0x112   : > { %2042 = vsyncadd (%p2864_p10), %s406_s3, 4294963200  ;;  %s2577_s20 = scalar_lea.vmem [#allocation8], %s1245_s0  ;;  %s424_s21 = scalar_lea.sflag [#allocation10], %s405_s22 }
 0x113   : > { %s2579_s28 = scalar_lea.vmem [#allocation9], %s1245_s0 }
 0x114   : > { %2044 = dma.done.wait (%p2864_p10), %s424_s21, 2064  }
 0x115   : > { %2046 = vsyncadd (%p2864_p10), %s424_s21, 4294965232  ;;  %s435_s15 = scalar_lea.vmem [#allocation11], %s2568_s24  ;;  %s441_s25 = scalar_lea.sflag [#allocation13], %s405_s22 }
 0x116   : > { %s443_s16 = scalar_lea.vmem [#allocation12], %s2568_s24 }
 0x117   : > { %2048 = dma.done.wait (%p2864_p10), %s441_s25, 16  }
 0x118   : > { %2050 = vsyncadd (%p2864_p10), %s441_s25, 4294967280  ;;  %p2865_p1 = scmp.eq.s32.totalorder %s2861_s14, 0 }
 0x11a   : > { %2052 = dma.done.wait (%p2865_p1), [#allocation13], 16   ;;  %p2866_p4 = pmov %p2865_p1 }
 0x11b   : > { %s2595_s30 = scalar_lea.vmem [#allocation15], %s1244_s23  ;;  %s2867_s17 = sld [smem:[#allocation25_spill]] }
 0x11c   : > { %2054 = vsyncadd (%p2866_p4), [#allocation13], 4294967280 }
 0x121   : > { %p1250_p12 = scmp.ne.s32.totalorder %s2867_s17, 0 }
 0x122   : > { %v2113_v0 = vmov (!%p1250_p12), 0.0  }
 0x123   : > { %507 = sbr.rel (%p1250_p12) target bundleno = 298 (0x12a), region = 80  ;;  %508 = vst [vmem:[#allocation2] sm:$0xff] (!%p1250_p12), %v2113_v0  ;;  %509 = vst [vmem:[#allocation2 + $0x8] sm:$0xff] (!%p1250_p12), %v2113_v0 }
 0x124   : > { %510 = vst [vmem:[#allocation2 + $0x10] sm:$0xff] (!%p1250_p12), %v2113_v0  ;;  %511 = vst [vmem:[#allocation2 + $0x18] sm:$0xff] (!%p1250_p12), %v2113_v0 }
 0x125   : > { %512 = vst [vmem:[#allocation2 + $0x20] sm:$0xff] (!%p1250_p12), %v2113_v0  ;;  %513 = vst [vmem:[#allocation2 + $0x28] sm:$0xff] (!%p1250_p12), %v2113_v0 }
 0x126   : > { %514 = vst [vmem:[#allocation2 + $0x30] sm:$0xff] (!%p1250_p12), %v2113_v0  ;;  %515 = vst [vmem:[#allocation2 + $0x38] sm:$0xff] (!%p1250_p12), %v2113_v0 }
 0x12a PF: > { %v524_v1 = vld [vmem:[%s2571_s12] sm:$0xff]  ;;  %v525_v2 = vld [vmem:[%s2571_s12 + $0x8] sm:$0xff]  ;;  %v526_v3 = vld [vmem:[%s2571_s12 + $0x10] sm:$0xff]  ;;  %s2868_s23 = sld [smem:[#allocation25_spill]] }
 0x12b   : > { %v1467_v4 = vpack.c.bf16 %v525_v2, %v524_v1  ;;  %v527_v5 = vld [vmem:[%s2571_s12 + $0x18] sm:$0xff]  ;;  %v528_v7 = vld [vmem:[%s2571_s12 + $0x20] sm:$0xff]  ;;  %v529_v8 = vld [vmem:[%s2571_s12 + $0x28] sm:$0xff] }
 0x12c   : > { %v1471_v6 = vpack.c.bf16 %v527_v5, %v526_v3  ;;  %v1475_v9 = vpack.c.bf16 %v529_v8, %v528_v7  ;;  %v530_v10 = vld [vmem:[%s2571_s12 + $0x30] sm:$0xff]  ;;  %v652_v11 = vld [vmem:[%s2577_s20] sm:$0xff]  ;;  %v653_v12 = vld [vmem:[%s2577_s20 + $0x8] sm:$0xff] }
 0x12d   : > { %1468 = vmatprep.subr.bf16.mxu0 %v1467_v4  ;;  %v531_v13 = vld [vmem:[%s2571_s12 + $0x38] sm:$0xff]  ;;  %v1499_v14 = vpack.c.bf16 %v653_v12, %v652_v11  ;;  %v516_v15 = vld [vmem:[%s2560_s18] sm:$0xff]  ;;  %v654_v16 = vld [vmem:[%s2577_s20 + $0x10] sm:$0xff] }
 0x12e   : > { %1470 = vmatpush3.bf16.msra.mxu0 %v1467_v4  ;;  %1367 = vmatprep.mubr.f32.mxu0 %v516_v15  ;;  %v655_v17 = vld [vmem:[%s2577_s20 + $0x18] sm:$0xff]  ;;  %v656_v19 = vld [vmem:[%s2577_s20 + $0x20] sm:$0xff]  ;;  %v657_v20 = vld [vmem:[%s2577_s20 + $0x28] sm:$0xff]  ;;  %v1479_v21 = vpack.c.bf16 %v531_v13, %v530_v10 }
 0x12f   : > { %1472 = vmatprep.subr.bf16.mxu0 %v1471_v6  ;;  %1411 = vmatprep.mubr.f32.mxu1 %v516_v15  ;;  %v1503_v18 = vpack.c.bf16 %v655_v17, %v654_v16  ;;  %v532_v22 = vld [vmem:[%s2571_s12 + $0x40] sm:$0xff]  ;;  %v533_v23 = vld [vmem:[%s2571_s12 + $0x48] sm:$0xff]  ;;  %v1507_v24 = vpack.c.bf16 %v657_v20, %v656_v19  ;;  %v658_v25 = vld [vmem:[%s2577_s20 + $0x30] sm:$0xff] }
 0x130   : > { %1500 = vmatprep.subr.bf16.mxu1 %v1499_v14  ;;  %v659_v26 = vld [vmem:[%s2577_s20 + $0x38] sm:$0xff]  ;;  %v1483_v27 = vpack.c.bf16 %v533_v23, %v532_v22  ;;  %v534_v28 = vld [vmem:[%s2571_s12 + $0x50] sm:$0xff]  ;;  %v660_v31 = vld [vmem:[%s2577_s20 + $0x40] sm:$0xff]  ;;  %p1253_p0 = scmp.ne.s32.totalorder %s2868_s23, 1 }
 0x131   : > { %1502 = vmatpush3.bf16.msra.mxu1 %v1499_v14  ;;  %v535_v29 = vld [vmem:[%s2571_s12 + $0x58] sm:$0xff]  ;;  %v1511_v30 = vpack.c.bf16 %v659_v26, %v658_v25  ;;  %v661_v32 = vld [vmem:[%s2577_s20 + $0x48] sm:$0xff]  ;;  %v536_v34 = vld [vmem:[%s2571_s12 + $0x60] sm:$0xff] }
 0x132   : > { %1474 = vmatpush3.bf16.msra.mxu0 %v1471_v6  ;;  %1504 = vmatprep.subr.bf16.mxu1 %v1503_v18  ;;  %v1487_v33 = vpack.c.bf16 %v535_v29, %v534_v28  ;;  %v537_v35 = vld [vmem:[%s2571_s12 + $0x68] sm:$0xff]  ;;  %v1515_v36 = vpack.c.bf16 %v661_v32, %v660_v31  ;;  %v662_v37 = vld [vmem:[%s2577_s20 + $0x50] sm:$0xff]  ;;  %v663_v38 = vld [vmem:[%s2577_s20 + $0x58] sm:$0xff] }
 0x133   : > { %1476 = vmatprep.subr.bf16.mxu0 %v1475_v9  ;;  %v1491_v39 = vpack.c.bf16 %v537_v35, %v536_v34  ;;  %v538_v40 = vld [vmem:[%s2571_s12 + $0x70] sm:$0xff]  ;;  %v539_v41 = vld [vmem:[%s2571_s12 + $0x78] sm:$0xff]  ;;  %v1519_v42 = vpack.c.bf16 %v663_v38, %v662_v37  ;;  %v664_v43 = vld [vmem:[%s2577_s20 + $0x60] sm:$0xff] }
 0x134   : > { %v665_v44 = vld [vmem:[%s2577_s20 + $0x68] sm:$0xff]  ;;  %v1495_v45 = vpack.c.bf16 %v539_v41, %v538_v40  ;;  %v666_v47 = vld [vmem:[%s2577_s20 + $0x70] sm:$0xff]  ;;  %v667_v48 = vld [vmem:[%s2577_s20 + $0x78] sm:$0xff] }
 0x135   : > { %1506 = vmatpush3.bf16.msra.mxu1 %v1503_v18  ;;  %v1523_v46 = vpack.c.bf16 %v665_v44, %v664_v43  ;;  %v1527_v49 = vpack.c.bf16 %v667_v48, %v666_v47  ;;  %v517_v50 = vld [vmem:[%s2560_s18 + $0x8] sm:$0xff]  ;;  %v518_v51 = vld [vmem:[%s2560_s18 + $0x10] sm:$0xff]  ;;  %v519_v52 = vld [vmem:[%s2560_s18 + $0x18] sm:$0xff] }
 0x136   : > { %1478 = vmatpush3.bf16.msra.mxu0 %v1475_v9  ;;  %1508 = vmatprep.subr.bf16.mxu1 %v1507_v24  ;;  %v520_v53 = vld [vmem:[%s2560_s18 + $0x20] sm:$0xff]  ;;  %v521_v54 = vld [vmem:[%s2560_s18 + $0x28] sm:$0xff]  ;;  %v522_v55 = vld [vmem:[%s2560_s18 + $0x30] sm:$0xff] }
 0x137   : > { %1480 = vmatprep.subr.bf16.mxu0 %v1479_v21  ;;  %v523_v56 = vld [vmem:[%s2560_s18 + $0x38] sm:$0xff]  ;;  %v844_v57 = vld [vmem:[%s2579_s28] sm:$0xff]  ;;  %v845_v58 = vld [vmem:[%s2579_s28 + $0x8] sm:$0xff] }
 0x138   : > { %v1531_v59 = vpack.c.bf16 %v845_v58, %v844_v57  ;;  %v846_v60 = vld [vmem:[%s2579_s28 + $0x10] sm:$0xff]  ;;  %v847_v61 = vld [vmem:[%s2579_s28 + $0x18] sm:$0xff]  ;;  %v848_v63 = vld [vmem:[%s2579_s28 + $0x20] sm:$0xff] }
 0x139   : > { %1510 = vmatpush3.bf16.msra.mxu1 %v1507_v24  ;;  %v1535_v62 = vpack.c.bf16 %v847_v61, %v846_v60  ;;  %v849_v0 = vld [vmem:[%s2579_s28 + $0x28] sm:$0xff]  ;;  %v850_v2 = vld [vmem:[%s2579_s28 + $0x30] sm:$0xff]  ;;  %v851_v3 = vld [vmem:[%s2579_s28 + $0x38] sm:$0xff] }
 0x13a   : > { %1482 = vmatpush3.bf16.msra.mxu0 %v1479_v21  ;;  %1512 = vmatprep.subr.bf16.mxu1 %v1511_v30  ;;  %v1539_v1 = vpack.c.bf16 %v849_v0, %v848_v63  ;;  %v1543_v4 = vpack.c.bf16 %v851_v3, %v850_v2  ;;  %v852_v5 = vld [vmem:[%s2579_s28 + $0x40] sm:$0xff]  ;;  %v853_v6 = vld [vmem:[%s2579_s28 + $0x48] sm:$0xff]  ;;  %v854_v8 = vld [vmem:[%s2579_s28 + $0x50] sm:$0xff] }
 0x13b   : > { %1484 = vmatprep.subr.bf16.mxu0 %v1483_v27  ;;  %v1547_v7 = vpack.c.bf16 %v853_v6, %v852_v5  ;;  %v855_v9 = vld [vmem:[%s2579_s28 + $0x58] sm:$0xff]  ;;  %v856_v11 = vld [vmem:[%s2579_s28 + $0x60] sm:$0xff]  ;;  %v857_v12 = vld [vmem:[%s2579_s28 + $0x68] sm:$0xff] }
 0x13c   : > { %v1551_v10 = vpack.c.bf16 %v855_v9, %v854_v8  ;;  %v1555_v13 = vpack.c.bf16 %v857_v12, %v856_v11  ;;  %v858_v14 = vld [vmem:[%s2579_s28 + $0x70] sm:$0xff]  ;;  %v859_v15 = vld [vmem:[%s2579_s28 + $0x78] sm:$0xff]  ;;  %v1251_v17 = vld [vmem:[%s435_s15] ss:$0 sm:$0xff] }
 0x13d   : > { %1514 = vmatpush3.bf16.msra.mxu1 %v1511_v30  ;;  %v1559_v16 = vpack.c.bf16 %v859_v15, %v858_v14  ;;  %v1252_v5 = vld [vmem:[%s443_s16] ss:$0 sm:$0xff] }
 0x13e   : > { %1486 = vmatpush3.bf16.msra.mxu0 %v1483_v27  ;;  %1516 = vmatprep.subr.bf16.mxu1 %v1515_v36 }
 0x13f   : > { %1488 = vmatprep.subr.bf16.mxu0 %v1487_v33 }
 0x141   : > { %1518 = vmatpush3.bf16.msra.mxu1 %v1515_v36 }
 0x142   : > { %1490 = vmatpush3.bf16.msra.mxu0 %v1487_v33  ;;  %1520 = vmatprep.subr.bf16.mxu1 %v1519_v42 }
 0x143   : > { %1492 = vmatprep.subr.bf16.mxu0 %v1491_v39 }
 0x145   : > { %1522 = vmatpush3.bf16.msra.mxu1 %v1519_v42 }
 0x146   : > { %1494 = vmatpush3.bf16.msra.mxu0 %v1491_v39  ;;  %1524 = vmatprep.subr.bf16.mxu1 %v1523_v46 }
 0x147   : > { %1496 = vmatprep.subr.bf16.mxu0 %v1495_v45 }
 0x149   : > { %1526 = vmatpush3.bf16.msra.mxu1 %v1523_v46 }
 0x14a   : > { %1498 = vmatpush3.bf16.msra.mxu0 %v1495_v45  ;;  %1528 = vmatprep.subr.bf16.mxu1 %v1527_v49 }
 0x14b   : > { %1532 = vmatprep.subr.bf16.mxu0 %v1531_v59 }
 0x14d   : > { %1368 = vmatmul.mubr.f32.vlgmr.msra.gmra.mrb[0].mxu0 %v517_v50  ;;  %1530 = vmatpush3.bf16.msra.mxu1 %v1527_v49 }
 0x14e   : > { %1370 = vmatprep.mubr.f32.mxu0 %v518_v51  ;;  %1563 = vmatprep.subr.bf16.mxu1 %v1531_v59 }
 0x14f   : > { %1534 = vmatpush3.bf16.msra.mxu0 %v1531_v59 }
 0x150   : > { %1412 = vmatmul.mubr.f32.vlgmr.msra.gmra.mrb[0].mxu1 %v517_v50  ;;  %1536 = vmatprep.subr.bf16.mxu0 %v1535_v62 }
 0x151   : > { %1371 = vmatmul.mubr.f32.gmra.mrb[2].mxu0 %v519_v52  ;;  %1414 = vmatprep.mubr.f32.mxu1 %v518_v51 }
 0x152   : > { %1373 = vmatprep.mubr.f32.mxu0 %v520_v53  ;;  %1571 = vmatpush3.bf16.msra.mxu1 %v1531_v59 }
 0x153   : > { %1564 = vmatprep.subr.bf16.mxu1 %v1535_v62  ;;  %1538 = vmatpush3.bf16.msra.mxu0 %v1535_v62 }
 0x154   : > { %1415 = vmatmul.mubr.f32.gmra.mrb[2].mxu1 %v519_v52  ;;  %1540 = vmatprep.subr.bf16.mxu0 %v1539_v1 }
 0x155   : > { %1374 = vmatmul.mubr.f32.gmra.mrb[4].mxu0 %v521_v54  ;;  %1417 = vmatprep.mubr.f32.mxu1 %v520_v53 }
 0x156   : > { %1376 = vmatprep.mubr.f32.mxu0 %v522_v55  ;;  %1572 = vmatpush3.bf16.msra.mxu1 %v1535_v62 }
 0x157   : > { %1565 = vmatprep.subr.bf16.mxu1 %v1539_v1  ;;  %1542 = vmatpush3.bf16.msra.mxu0 %v1539_v1 }
 0x158   : > { %1418 = vmatmul.mubr.f32.gmra.mrb[4].mxu1 %v521_v54  ;;  %1544 = vmatprep.subr.bf16.mxu0 %v1543_v4 }
 0x159   : > { %1377 = vmatmul.mubr.f32.gmra.mrb[6].mxu0 %v523_v56  ;;  %1420 = vmatprep.mubr.f32.mxu1 %v522_v55 }
 0x15a   : > { %1573 = vmatpush3.bf16.msra.mxu1 %v1539_v1 }
 0x15b   : > { %1566 = vmatprep.subr.bf16.mxu1 %v1543_v4  ;;  %1546 = vmatpush3.bf16.msra.mxu0 %v1543_v4 }
 0x15c   : > { %1421 = vmatmul.mubr.f32.gmra.mrb[6].mxu1 %v523_v56  ;;  %1548 = vmatprep.subr.bf16.mxu0 %v1547_v7 }
 0x15e   : > { %1574 = vmatpush3.bf16.msra.mxu1 %v1543_v4 }
 0x15f   : > { %1567 = vmatprep.subr.bf16.mxu1 %v1547_v7  ;;  %1550 = vmatpush3.bf16.msra.mxu0 %v1547_v7 }
 0x160   : > { %1552 = vmatprep.subr.bf16.mxu0 %v1551_v10 }
 0x162   : > { %1575 = vmatpush3.bf16.msra.mxu1 %v1547_v7 }
 0x163   : > { %1568 = vmatprep.subr.bf16.mxu1 %v1551_v10  ;;  %1554 = vmatpush3.bf16.msra.mxu0 %v1551_v10 }
 0x164   : > { %1556 = vmatprep.subr.bf16.mxu0 %v1555_v13 }
 0x166   : > { %1576 = vmatpush3.bf16.msra.mxu1 %v1551_v10 }
 0x167   : > { %1569 = vmatprep.subr.bf16.mxu1 %v1555_v13  ;;  %1558 = vmatpush3.bf16.msra.mxu0 %v1555_v13 }
 0x168   : > { %1560 = vmatprep.subr.bf16.mxu0 %v1559_v16 }
 0x16a   : > { %1577 = vmatpush3.bf16.msra.mxu1 %v1555_v13 }
 0x16b   : > { %1570 = vmatprep.subr.bf16.mxu1 %v1559_v16  ;;  %1562 = vmatpush3.bf16.msra.mxu0 %v1559_v16 }
 0x16e   : > { %1578 = vmatpush3.bf16.msra.mxu1 %v1559_v16 }
 0x220   : > { %v1369_v18 = vpop.f32.mrb[0].mxu0 }
 0x221   : > { %v2656_v19 = vadd.f32 %v1369_v18, %v1251_v17  ;;  %v613_v20 = vpop.f32.mrb[1].mxu0 }
 0x222   : > { %v2658_v21 = vadd.f32 %v1251_v17, %v613_v20 }
 0x223   : > { %v781_v22 = vsub.f32 0.0, %v2656_v19  ;;  %v1413_v28 = vpop.f32.mrb[0].mxu1 }
 0x224   : > { %v780_v23 = vsub.f32 0.0, %v2658_v21  ;;  %v1372_v24 = vpop.f32.mrb[2].mxu0  ;;  %v741_v31 = vpop.f32.mrb[1].mxu1  ;;  %v747_v8 = vadd.f32 %v1413_v28, %v1252_v5 }
 0x225   : > { %v790_v25 = vmul.f32 1.442695, %v781_v22  ;;  %v2662_v26 = vadd.f32 %v1372_v24, %v1251_v17  ;;  %v623_v27 = vpop.f32.mrb[3].mxu0  ;;  %v742_v11 = vadd.f32 %v1252_v5, %v741_v31 }
 0x226   : > { %v788_v29 = vmul.f32 1.442695, %v780_v23  ;;  %v2664_v30 = vadd.f32 %v1251_v17, %v623_v27 }
 0x227   : > { %1723 = vpow2.f32 %v790_v25  ;;  %v783_v32 = vsub.f32 0.0, %v2662_v26  ;;  %v1416_v38 = vpop.f32.mrb[2].mxu1 }
 0x228   : > { %1725 = vpow2.f32 %v788_v29  ;;  %v782_v33 = vsub.f32 0.0, %v2664_v30  ;;  %v1375_v34 = vpop.f32.mrb[4].mxu0  ;;  %v751_v41 = vpop.f32.mrb[3].mxu1  ;;  %v757_v18 = vadd.f32 %v1416_v38, %v1252_v5 }
 0x229   : > { %v794_v35 = vmul.f32 1.442695, %v783_v32  ;;  %v2668_v36 = vadd.f32 %v1375_v34, %v1251_v17  ;;  %v633_v37 = vpop.f32.mrb[5].mxu0  ;;  %v752_v23 = vadd.f32 %v1252_v5, %v751_v41 }
 0x22a   : > { %v792_v39 = vmul.f32 1.442695, %v782_v33  ;;  %v2670_v40 = vadd.f32 %v1251_v17, %v633_v37 }
 0x22b   : > { %1727 = vpow2.f32 %v794_v35  ;;  %v785_v42 = vsub.f32 0.0, %v2668_v36  ;;  %v1419_v48 = vpop.f32.mrb[4].mxu1 }
 0x22c   : > { %1729 = vpow2.f32 %v792_v39  ;;  %v784_v43 = vsub.f32 0.0, %v2670_v40  ;;  %v1378_v44 = vpop.f32.mrb[6].mxu0  ;;  %v761_v51 = vpop.f32.mrb[5].mxu1  ;;  %v767_v29 = vadd.f32 %v1419_v48, %v1252_v5 }
 0x22d   : > { %v798_v45 = vmul.f32 1.442695, %v785_v42  ;;  %v2674_v46 = vadd.f32 %v1378_v44, %v1251_v17  ;;  %v643_v47 = vpop.f32.mrb[7].mxu0 }
 0x22e   : > { %v796_v49 = vmul.f32 1.442695, %v784_v43  ;;  %v2676_v50 = vadd.f32 %v1251_v17, %v643_v47 }
 0x22f   : > { %1731 = vpow2.f32 %v798_v45  ;;  %v787_v52 = vsub.f32 0.0, %v2674_v46  ;;  %v1422_v56 = vpop.f32.mrb[6].mxu1 }
 0x230   : > { %1733 = vpow2.f32 %v796_v49  ;;  %v786_v53 = vsub.f32 0.0, %v2676_v50  ;;  %v771_v60 = vpop.f32.mrb[7].mxu1  ;;  %v777_v37 = vadd.f32 %v1422_v56, %v1252_v5  ;;  %v841_v56 = vld [vmem:[#allocation2 + $0x28] sm:$0xff] }
 0x231   : > { %v1724_v54 = vpop.eup %1723  ;;  %v802_v55 = vmul.f32 1.442695, %v787_v52  ;;  %v772_v39 = vadd.f32 %v1252_v5, %v771_v60  ;;  %v838_v52 = vld [vmem:[#allocation2 + $0x10] sm:$0xff] }
 0x232   : > { %v1726_v57 = vpop.eup %1725  ;;  %v805_v58 = vadd.f32 1.0, %v1724_v54  ;;  %v800_v59 = vmul.f32 1.442695, %v786_v53 }
 0x233   : > { %v804_v61 = vadd.f32 1.0, %v1726_v57  ;;  %1735 = vpow2.f32 %v802_v55 }
 0x234   : > { %1737 = vrcp.f32 %v805_v58 }
 0x235   : > { %v1728_v62 = vpop.eup %1727  ;;  %1739 = vrcp.f32 %v804_v61  ;;  %v843_v61 = vld [vmem:[#allocation2 + $0x38] sm:$0xff] }
 0x236   : > { %v1730_v63 = vpop.eup %1729  ;;  %v807_v0 = vadd.f32 1.0, %v1728_v62  ;;  %1741 = vpow2.f32 %v800_v59  ;;  %v842_v62 = vld [vmem:[#allocation2 + $0x30] sm:$0xff] }
 0x237   : > { %v806_v1 = vadd.f32 1.0, %v1730_v63 }
 0x238   : > { %1743 = vrcp.f32 %v807_v0 }
 0x239   : > { %v1732_v2 = vpop.eup %1731  ;;  %1745 = vrcp.f32 %v806_v1 }
 0x23a   : > { %v1734_v3 = vpop.eup %1733  ;;  %v809_v4 = vadd.f32 1.0, %v1732_v2 }
 0x23b   : > { %v808_v6 = vadd.f32 1.0, %v1734_v3 }
 0x23c   : > { %1747 = vrcp.f32 %v809_v4  ;;  %v1254_v4 = vld [vmem:[#allocation14] ss:$0 sm:$0xff] (!%p1253_p0) }
 0x23d   : > { %v1736_v7 = vpop.eup %1735  ;;  %1749 = vrcp.f32 %v808_v6 }
 0x23e   : > { %v1738_v9 = vpop.eup %1737  ;;  %v811_v10 = vadd.f32 1.0, %v1736_v7 }
 0x23f   : > { %v1740_v12 = vpop.eup %1739  ;;  %v815_v13 = vmul.f32 %v1738_v9, %v2656_v19 }
 0x240   : > { %v1742_v14 = vpop.eup %1741  ;;  %v813_v15 = vmul.f32 %v1740_v12, %v2658_v21  ;;  %1751 = vrcp.f32 %v811_v10  ;;  %v762_v21 = vadd.f32 %v1252_v5, %v761_v51  ;;  %v839_v51 = vld [vmem:[#allocation2 + $0x18] sm:$0xff] }
 0x241   : > { %v810_v16 = vadd.f32 1.0, %v1742_v14  ;;  %v829_v17 = vmul.f32 %v815_v13, %v747_v8 }
 0x242   : > { %v1744_v20 = vpop.eup %1743  ;;  %v828_v22 = vmul.f32 %v813_v15, %v742_v11 }
 0x243   : > { %v1746_v24 = vpop.eup %1745  ;;  %v819_v25 = vmul.f32 %v1744_v20, %v2662_v26  ;;  %1753 = vrcp.f32 %v810_v16 }
 0x244   : > { %v817_v27 = vmul.f32 %v1746_v24, %v2664_v30  ;;  %1455 = vmatprep.mubr.f32.mxu0 %v828_v22 }
 0x245   : > { %v831_v28 = vmul.f32 %v819_v25, %v757_v18  ;;  %1456 = vmatmul.mubr.f32.vlgmr.msra.gmra.mrb[8].mxu0 %v829_v17 }
 0x246   : > { %v1748_v19 = vpop.eup %1747  ;;  %v830_v31 = vmul.f32 %v817_v27, %v752_v23 }
 0x247   : > { %v1750_v32 = vpop.eup %1749  ;;  %v823_v33 = vmul.f32 %v1748_v19, %v2668_v36  ;;  %v837_v36 = vld [vmem:[#allocation2 + $0x8] sm:$0xff] }
 0x248   : > { %v821_v34 = vmul.f32 %v1750_v32, %v2670_v40  ;;  %1458 = vmatprep.mubr.f32.mxu0 %v830_v31  ;;  %v836_v40 = vld [vmem:[#allocation2] sm:$0xff] }
 0x249   : > { %v833_v35 = vmul.f32 %v823_v33, %v767_v29  ;;  %1459 = vmatmul.mubr.f32.gmra.mrb[10].mxu0 %v831_v28 }
 0x24a   : > { %v1752_v26 = vpop.eup %1751  ;;  %v832_v38 = vmul.f32 %v821_v34, %v762_v21 }
 0x24b   : > { %v827_v30 = vmul.f32 %v1752_v26, %v2674_v46 }
 0x24c   : > { %1461 = vmatprep.mubr.f32.mxu1 %v832_v38 }
 0x24d   : > { %v1754_v41 = vpop.eup %1753  ;;  %v835_v42 = vmul.f32 %v827_v30, %v777_v37  ;;  %1462 = vmatmul.mubr.f32.vlgmr.msra.gmra.mrb[8].mxu1 %v833_v35 }
 0x24e   : > { %v825_v43 = vmul.f32 %v1754_v41, %v2676_v50  ;;  %v840_v50 = vld [vmem:[#allocation2 + $0x20] sm:$0xff] }
 0x250   : > { %v834_v44 = vmul.f32 %v825_v43, %v772_v39 }
 0x252   : > { %1464 = vmatprep.mubr.f32.mxu1 %v834_v44 }
 0x253   : > { %1465 = vmatmul.mubr.f32.gmra.mrb[10].mxu1 %v835_v42 }
 0x318   : > { %v1457_v45 = vpop.f32.mrb[8].mxu0 }
 0x319   : > { %v966_v47 = vadd.f32 %v1457_v45, %v837_v36  ;;  %v926_v48 = vpop.f32.mrb[9].mxu0 }
 0x31a   : > { %v965_v49 = vadd.f32 %v926_v48, %v836_v40 }
 0x31b   : > { %974 = vst [vmem:[#allocation2 + $0x8] sm:$0xff] %v966_v47 }
 0x31c   : > { %973 = vst [vmem:[#allocation2] sm:$0xff] %v965_v49  ;;  %v1460_v46 = vpop.f32.mrb[10].mxu0 }
 0x31d   : > { %v968_v53 = vadd.f32 %v1460_v46, %v839_v51  ;;  %v936_v54 = vpop.f32.mrb[11].mxu0 }
 0x31e   : > { %v967_v55 = vadd.f32 %v936_v54, %v838_v52 }
 0x31f   : > { %976 = vst [vmem:[#allocation2 + $0x18] sm:$0xff] %v968_v53 }
 0x320   : > { %975 = vst [vmem:[#allocation2 + $0x10] sm:$0xff] %v967_v55  ;;  %v1463_v57 = vpop.f32.mrb[8].mxu1 }
 0x321   : > { %v970_v58 = vadd.f32 %v1463_v57, %v841_v56  ;;  %v946_v59 = vpop.f32.mrb[9].mxu1 }
 0x322   : > { %v969_v60 = vadd.f32 %v946_v59, %v840_v50  ;;  %v986_v5 = vld [vmem:[#allocation2 + $0x8] sm:$0xff] (!%p1253_p0) }
 0x323   : > { %978 = vst [vmem:[#allocation2 + $0x28] sm:$0xff] %v970_v58  ;;  %v985_v3 = vld [vmem:[#allocation2] sm:$0xff] (!%p1253_p0)  ;;  %v1001_v7 = vadd.f32 (!%p1253_p0), %v1254_v4, %v986_v5 }
 0x324   : > { %977 = vst [vmem:[#allocation2 + $0x20] sm:$0xff] %v969_v60  ;;  %984 = sbr.rel (%p1253_p0) target bundleno = 821 (0x335), region = 84  ;;  %v1000_v6 = vadd.f32 (!%p1253_p0), %v1254_v4, %v985_v3 }
 0x325   : > { %1009 = vst [vmem:[%s2595_s30 + $0x8] sm:$0xff] (!%p1253_p0), %v1001_v7 }
 0x326   : > { %v1466_v63 = vpop.f32.mrb[10].mxu1  ;;  %v988_v9 = vld [vmem:[#allocation2 + $0x18] sm:$0xff] (!%p1253_p0)  ;;  %1008 = vst [vmem:[%s2595_s30] sm:$0xff] (!%p1253_p0), %v1000_v6 }
 0x327   : > { %v972_v0 = vadd.f32 %v1466_v63, %v843_v61  ;;  %v956_v1 = vpop.f32.mrb[11].mxu1  ;;  %v987_v8 = vld [vmem:[#allocation2 + $0x10] sm:$0xff] (!%p1253_p0)  ;;  %v1003_v12 = vadd.f32 (!%p1253_p0), %v1254_v4, %v988_v9 }
 0x328   : > { %v971_v2 = vadd.f32 %v956_v1, %v842_v62  ;;  %v1002_v11 = vadd.f32 (!%p1253_p0), %v1254_v4, %v987_v8 }
 0x329   : > { %980 = vst [vmem:[#allocation2 + $0x38] sm:$0xff] %v972_v0  ;;  %1011 = vst [vmem:[%s2595_s30 + $0x18] sm:$0xff] (!%p1253_p0), %v1003_v12 }
 0x32a   : > { %979 = vst [vmem:[#allocation2 + $0x30] sm:$0xff] %v971_v2  ;;  %v990_v14 = vld [vmem:[#allocation2 + $0x28] sm:$0xff] (!%p1253_p0)  ;;  %1010 = vst [vmem:[%s2595_s30 + $0x10] sm:$0xff] (!%p1253_p0), %v1002_v11 }
 0x32b   : > { %v989_v10 = vld [vmem:[#allocation2 + $0x20] sm:$0xff]  ;;  %v1005_v17 = vadd.f32 %v1254_v4, %v990_v14 }
 0x32c   : > { %v1004_v13 = vadd.f32 %v1254_v4, %v989_v10 }
 0x32d   : > { %1013 = vst [vmem:[%s2595_s30 + $0x28] sm:$0xff] %v1005_v17 }
 0x32e   : > { %1012 = vst [vmem:[%s2595_s30 + $0x20] sm:$0xff] %v1004_v13 }
 0x330   : > { %v992_v16 = vld [vmem:[#allocation2 + $0x38] sm:$0xff] }
 0x331   : > { %v991_v15 = vld [vmem:[#allocation2 + $0x30] sm:$0xff]  ;;  %v1007_v20 = vadd.f32 %v1254_v4, %v992_v16 }
 0x332   : > { %v1006_v18 = vadd.f32 %v1254_v4, %v991_v15 }
 0x333   : > { %1015 = vst [vmem:[%s2595_s30 + $0x38] sm:$0xff] %v1007_v20 }
 0x334   : > { %1014 = vst [vmem:[%s2595_s30 + $0x30] sm:$0xff] %v1006_v18 }
 0x335 PF: > { %s2869_s18 = sld [smem:[#allocation26_spill]]  ;;  %s2870_s14 = sld [smem:[#allocation30_spill]] }
 0x336   : > { %s2871_s24 = sld [smem:[#allocation38_spill]]  ;;  %s1030_s12 = sshll.u32 %s2595_s30, 4  ;;  %s2706_s12 = int_to_ptr.vmem [resolvable:$true] %s1030_s12 }
 0x337   : > { %s1017_s20 = scalar_lea.sflag [#allocation5], %s2556_s8  ;;  %s1963_s21 = scalar_lea.vmem %s2706_s12, 1024 }
 0x338   : > { %p1964_p8 = scmp.ne.s32.totalorder %s2706_s12, %s1963_s21  ;;  %s2114_s28 = smov [#allocation15]  }
 0x339   : > { %s1967_s15 = sshll.u32 %s2114_s28, 4  ;;  %s1968_s15 = int_to_ptr.vmem [resolvable:$false] %s1967_s15 }
 0x33a   : > { %s1969_s25 = scalar_lea.vmem %s1968_s15, 2048  ;;  %p1970_p3 = scmp.lt.s32.totalorder %s2706_s12, %s1968_s15 }
 0x33b   : > { %s1262_s1 = sshll.u32 %s2869_s18, 10  ;;  %p2873_p5 = scmp.ne.s32.totalorder %s2870_s14, 0 }
 0x33c   : > { %s2872_s0 = smov %s2871_s24  ;;  %s2703_s3 = scalar_lea.hbm %s2871_s24, %s1262_s1 }
 0x33d   : > { %p1965_p7 = pnand %p1964_p8, %p2873_p5  ;;  %p1971_p2 = scmp.lt.s32.totalorder %s1969_s25, %s1963_s21 }
 0x33f   : > { %p1966_p11 = pneg %p1965_p7  ;;  %p1972_p13 = por %p1971_p2, %p1970_p3 }
 0x341   : > { %p1973_p9 = pnand %p1972_p13, %p1966_p11 }
 0x343   : > { %1976 = shalt.err (!%p1973_p9)
}
 0x344   : > { %s1977_s16 = scalar_lea.hbm %s2703_s3, 1024  ;;  %s1981_s23 = scalar_lea.hbm %s2872_s0, 2048 }
 0x345   : > { %p1978_p6 = scmp.ne.s32.totalorder %s2703_s3, %s1977_s16  ;;  %p1982_p4 = scmp.lt.u32.totalorder %s2703_s3, %s2872_s0 }
 0x346   : > { %p1983_p12 = scmp.lt.u32.totalorder %s1981_s23, %s1977_s16  ;;  %p1985_p8 = scmp.lt.u32.totalorder %s1977_s16, %s2703_s3 }
 0x347   : > { %p1979_p10 = pnand %p1978_p6, %p2873_p5 }
 0x348   : > { %p1984_p0 = por %p1983_p12, %p1982_p4 }
 0x349   : > { %p1980_p1 = pneg %p1979_p10 }
 0x34a   : > { %p1986_p7 = por %p1985_p8, %p1984_p0 }
 0x34c   : > { %p1987_p11 = pnand %p1986_p7, %p1980_p1 }
 0x34e   : > { %1990 = shalt.err (!%p1987_p11)
}
 0x34f   : > { %s2115_s6 = smov 128   ;;  %s2116_s22 = smov 8  }
 0x350   : > { %1595 = dma.vmem_to_hbm [thread:$0]  (%p2873_p5), %s2706_s12, 1024, %s2703_s3, %s1017_s20, %s2115_s6, %s2115_s6, %s2116_s22  }
 0x351 PF: > { %s2874_s24 = sld [smem:[#allocation23_spill]]  ;;  %s2875_s21 = sld [smem:[#allocation31_spill]] }
 0x352   : > { %p1627_p3 = scmp.ge.s32.totalorder %s2101_s11, 2 }
 0x357   : > { %s1045_s28 = sand.u32 1, %s2874_s24   ;;  %p2876_p2 = scmp.ne.s32.totalorder %s2875_s21, 0 }
 0x358   : > { %s1046_s15 = scalar_lea.sflag [#allocation5], %s1045_s28 }
 0x359   : > { %p1621_p13 = pnand %p1627_p3, %p2876_p2 }
 0x35b   : > { %2056 = dma.done.wait (!%p1621_p13), %s1046_s15, 1024  }
 0x35c   : > { %2058 = vsyncadd (!%p1621_p13), %s1046_s15, 4294966272  ;;  %s32_s11 = sadd.s32 1, %s2101_s11   ;;  %s2877_s24 = sld [smem:[#allocation22_spill]] }
 0x35d   : > { %p29_p9 = scmp.ge.s32.totalorder %s32_s11, 6   ;;  %s2878_s14 = sld [smem:[#allocation24_spill]] }
 0x35e   : > { %s2879_s25 = smov %s2069_s26  ;;  %s2880_s26 = smov %s2420_s27 }
 0x35f   : > { %s2882_s28 = smov %s2081_s29  ;;  %s2883_s29 = smov %s2437_s19 }
 0x360   : > { %s2884_s30 = smov %s2093_s9  ;;  %s2885_s8 = smov %s2097_s10 }
 0x361   : > { %s2886_s9 = smov %s2889_s7  ;;  %s2887_s10 = smov %s2893_s13 }
 0x362   :  { %31 = sbr.rel (!%p29_p9) target bundleno = 22 (0x16), region = 166 }
 0x363   : > { %s2881_s27 = smov %s2878_s14 }
 0x369   :  { %1051 = vsyncpa [#allocation4], 1 }
 0x36a   :  { %1053 = vsyncpa [#allocation4 + $0x1], 1 }
 0x36b   :  { %1054 = vsyncpa [#allocation7], 1 }
 0x36c   :  { %1056 = vsyncpa [#allocation7 + $0x1], 1 }
 0x36d   :  { %1057 = vsyncpa [#allocation10], 1 }
 0x36e   :  { %1059 = vsyncpa [#allocation10 + $0x1], 1 }
 0x36f   :  { %1060 = vsyncpa [#allocation13], 1 }
 0x370   :  { %1062 = vsyncpa [#allocation13 + $0x1], 1 }
 0x371   :  { %1063 = vsyncpa [#allocation5], 1 }
 0x372   :  { %1065 = vsyncpa [#allocation5 + $0x1], 1 }

</bundles_post_ra>
